<compile_context>
chip_gen: v7x
topology: tpu7x:2x2x1
jax: 0.10.0
libtpu: 0.0.40
codegen_flags: <defaults>
</compile_context>

<pallas_src>
import functools

import jax
import jax.numpy as jnp
from jax import lax
from jax.experimental import pallas as pl
from jax.experimental.pallas import tpu as pltpu


def _fm_kernel(nid_ref, x_ref, emb_hbm, out_hbm, gbuf, gsem, ssem,
               *, gamma, rows_per_block, dmas_in_flight):
    B = rows_per_block
    K = dmas_in_flight          # power of two, K <= B
    base = pl.program_id(0) * B

    def gather_copy(row, slot):
        nid = nid_ref[base + row]
        return pltpu.make_async_copy(
            emb_hbm.at[pl.ds(nid, 1)], gbuf.at[pl.ds(row, 1)], gsem.at[slot])

    def scatter_copy(row, slot):
        nid = nid_ref[base + row]
        return pltpu.make_async_copy(
            gbuf.at[pl.ds(row, 1)], out_hbm.at[pl.ds(nid, 1)], ssem.at[slot])

    # ---- Gather: emb[nid[base+r]] -> gbuf[r], K row-DMAs in flight. ----
    for r in range(K):                       # prime the window (static unroll)
        gather_copy(r, r).start()

    def gather_steady(r, carry):
        slot = r & (K - 1)
        gather_copy(r - K, slot).wait()      # retire the DMA holding this slot
        gather_copy(r, slot).start()
        return carry

    lax.fori_loop(K, B, gather_steady, 0, unroll=False)

    for r in range(B - K, B):                # drain (static unroll)
        gather_copy(r, r & (K - 1)).wait()

    # ---- Blend the whole (B, D) tile on the VPU; compute in f32. ----
    g = jnp.float32(gamma)
    blended = (g * x_ref[...].astype(jnp.float32)
               + (jnp.float32(1.0) - g) * gbuf[...].astype(jnp.float32))
    gbuf[...] = blended.astype(gbuf.dtype)   # explicit downcast before the DMA

    # ---- Scatter: gbuf[r] -> emb[nid[base+r]], K row-DMAs in flight. ----
    for r in range(K):
        scatter_copy(r, r).start()

    def scatter_steady(r, carry):
        slot = r & (K - 1)
        scatter_copy(r - K, slot).wait()
        scatter_copy(r, slot).start()
        return carry

    lax.fori_loop(K, B, scatter_steady, 0, unroll=False)

    for r in range(B - K, B):                # drain before the step ends
        scatter_copy(r, r & (K - 1)).wait()


def feature_momentum_forward(emb, x, hist_n_id, gamma, *,
                             rows_per_block=256, dmas_in_flight=8,
                             min_pallas_rows=512):
    """Functional FeatureMomentum.forward: returns the updated embedding table.

    Precondition: hist_n_id contains unique row ids (duplicates would race the
    pipelined gather/scatter; PyTorch's scatter is last-write-wins there).
    """
    M, D = x.shape
    N, D2 = emb.shape
    assert D == D2
    hist_n_id = hist_n_id.astype(jnp.int32)
    gamma = float(gamma)

    # Tiny pushes: the pallas_call launch overhead exceeds the XLA
    # gather/scatter cost, so stay in plain JAX.
    if M < min_pallas_rows:
        g = jnp.float32(gamma)
        blended = (g * x.astype(jnp.float32)
                   + (1.0 - g) * emb[hist_n_id].astype(jnp.float32))
        return emb.at[hist_n_id].set(blended.astype(emb.dtype))

    B = int(rows_per_block)
    assert B % 8 == 0, "rows_per_block must be a multiple of 8 (f32 sublanes)"
    K = min(int(dmas_in_flight), B)
    assert K >= 1 and (K & (K - 1)) == 0, "dmas_in_flight must be a power of two"

    # Pad the push to a whole number of row blocks by duplicating the last
    # (id, x) pair: the duplicates gather the same original row and rewrite the
    # identical blended value, which is idempotent.
    pad = (-M) % B
    if pad:
        hist_n_id = jnp.concatenate(
            [hist_n_id, jnp.broadcast_to(hist_n_id[-1:], (pad,))])
        x = jnp.concatenate([x, jnp.broadcast_to(x[-1:], (pad, D))], axis=0)
    num_blocks = (M + pad) // B

    kernel = functools.partial(
        _fm_kernel, gamma=gamma, rows_per_block=B, dmas_in_flight=K)

    grid_spec = pltpu.PrefetchScalarGridSpec(
        num_scalar_prefetch=1,                            # hist_n_id -> SMEM
        grid=(num_blocks,),
        in_specs=[
            pl.BlockSpec((B, D), lambda i, nid: (i, 0)),  # x block i -> VMEM
            pl.BlockSpec(memory_space=pl.ANY),            # emb table stays in HBM
        ],
        out_specs=pl.BlockSpec(memory_space=pl.ANY),      # updated table (HBM)
        scratch_shapes=[
            pltpu.VMEM((B, D), emb.dtype),                # gather/blend buffer
            pltpu.SemaphoreType.DMA((K,)),                # gather semaphores
            pltpu.SemaphoreType.DMA((K,)),                # scatter semaphores
        ],
    )

    return pl.pallas_call(
        kernel,
        grid_spec=grid_spec,
        out_shape=jax.ShapeDtypeStruct((N, D), emb.dtype),
        # Flat operand order is (hist_n_id, x, emb); alias the table (index 2)
        # to output 0 so rows not named in hist_n_id keep their old values.
        input_output_aliases={2: 0},
        compiler_params=pltpu.CompilerParams(
            # Unique ids => disjoint row writes per block, safe to shard the
            # row-block axis across TensorCores (2x on v7x, neutral elsewhere).
            dimension_semantics=("parallel",)),
    )(hist_n_id, x, emb)


if __name__ == "__main__":
    key = jax.random.PRNGKey(0)
    N, D, M = 128, 128, 20          # num_embeddings, embedding_dim, pushed rows
    gamma = 0.25

    k1, k2, k3 = jax.random.split(key, 3)
    # reset_parameters() zero-fills the table; simulate a prior full `push` with
    # random history so the momentum blend is non-trivial.
    emb = jax.random.normal(k1, (N, D), dtype=jnp.float32)
    x = jax.random.normal(k2, (M, D), dtype=jnp.float32)
    # Unique indices (hard precondition, see docstring).
    hist_n_id = jax.random.permutation(k3, N)[:M].astype(jnp.int32)

    # Pure-JAX reference (computed before the kernel call).
    expected = emb.at[hist_n_id].set(gamma * x + (1.0 - gamma) * emb[hist_n_id])

    # Small demo shapes: force the Pallas path (min_pallas_rows=0) with a tiny
    # row block so the grid, padding, and DMA window are all exercised.
    # Production: rows_per_block=256..1024, dmas_in_flight=8 (16 on v7x),
    # min_pallas_rows=512.
    updated = feature_momentum_forward(emb, x, hist_n_id, gamma,
                                       rows_per_block=8, dmas_in_flight=4,
                                       min_pallas_rows=0)
    updated = jax.block_until_ready(updated)

    assert jnp.allclose(updated, expected, atol=1e-6, rtol=1e-6), "mismatch vs reference"
    print("KERNEL_OK")
</pallas_src>

<mosaic_0001>
module attributes {stable_mosaic.version = 11 : i64} {
  func.func @_fm_kernel(%arg0: i32, %arg1: memref<24xi32, #tpu.memory_space<smem>>, %arg2: memref<8x128xf32, #tpu.memory_space<vmem>>, %arg3: memref<128x128xf32, #tpu.memory_space<any>>, %arg4: memref<128x128xf32, #tpu.memory_space<any>>, %arg5: memref<8x128xf32, #tpu.memory_space<vmem>>, %arg6: memref<4x!tpu.dma_semaphore, #tpu.memory_space<semaphore_mem>>, %arg7: memref<4x!tpu.dma_semaphore, #tpu.memory_space<semaphore_mem>>) attributes {dimension_semantics = [#tpu.dimension_semantics<parallel>], iteration_bounds = array<i64: 3>, scalar_prefetch = 1 : i64, scratch_operands = 3 : i64, tpu.core_type = #tpu.core_type<tc>, window_params = [{transform_indices = @transform_0, window_bounds = array<i64: 8, 128>}, {}, {}]} {
    %c8_i32 = arith.constant 8 : i32
    %0 = arith.muli %arg0, %c8_i32 : i32
    %c0_i32 = arith.constant 0 : i32
    %1 = arith.addi %0, %c0_i32 : i32
    %2 = arith.index_cast %1 : i32 to index
    %3 = memref.load %arg1[%2] : memref<24xi32, #tpu.memory_space<smem>>
    %c0_i32_0 = arith.constant 0 : i32
    %c0_i32_1 = arith.constant 0 : i32
    %4 = tpu.memref_slice %arg3[%3, %c0_i32_1] : memref<128x128xf32, #tpu.memory_space<any>> -> memref<1x128xf32, #tpu.memory_space<any>>
    %c0_i32_2 = arith.constant 0 : i32
    %c0_i32_3 = arith.constant 0 : i32
    %5 = tpu.memref_slice %arg5[%c0_i32_2, %c0_i32_3] : memref<8x128xf32, #tpu.memory_space<vmem>> -> memref<1x128xf32, #tpu.memory_space<vmem>>
    %6 = tpu.memref_slice %arg6[%c0_i32_0] : memref<4x!tpu.dma_semaphore, #tpu.memory_space<semaphore_mem>> -> memref<1x!tpu.dma_semaphore, #tpu.memory_space<semaphore_mem>>
    %7 = tpu.memref_squeeze %6 : memref<1x!tpu.dma_semaphore, #tpu.memory_space<semaphore_mem>> -> memref<!tpu.dma_semaphore, #tpu.memory_space<semaphore_mem>>
    tpu.enqueue_dma source(%4 : memref<1x128xf32, #tpu.memory_space<any>>) target(%5 : memref<1x128xf32, #tpu.memory_space<vmem>>) target_semaphore(%7 : memref<!tpu.dma_semaphore, #tpu.memory_space<semaphore_mem>>)
    %c1_i32 = arith.constant 1 : i32
    %8 = arith.addi %0, %c1_i32 : i32
    %9 = arith.index_cast %8 : i32 to index
    %10 = memref.load %arg1[%9] : memref<24xi32, #tpu.memory_space<smem>>
    %c1_i32_4 = arith.constant 1 : i32
    %c0_i32_5 = arith.constant 0 : i32
    %11 = tpu.memref_slice %arg3[%10, %c0_i32_5] : memref<128x128xf32, #tpu.memory_space<any>> -> memref<1x128xf32, #tpu.memory_space<any>>
    %c1_i32_6 = arith.constant 1 : i32
    %c0_i32_7 = arith.constant 0 : i32
    %12 = tpu.memref_slice %arg5[%c1_i32_6, %c0_i32_7] : memref<8x128xf32, #tpu.memory_space<vmem>> -> memref<1x128xf32, #tpu.memory_space<vmem>>
    %13 = tpu.memref_slice %arg6[%c1_i32_4] : memref<4x!tpu.dma_semaphore, #tpu.memory_space<semaphore_mem>> -> memref<1x!tpu.dma_semaphore, #tpu.memory_space<semaphore_mem>>
    %14 = tpu.memref_squeeze %13 : memref<1x!tpu.dma_semaphore, #tpu.memory_space<semaphore_mem>> -> memref<!tpu.dma_semaphore, #tpu.memory_space<semaphore_mem>>
    tpu.enqueue_dma source(%11 : memref<1x128xf32, #tpu.memory_space<any>>) target(%12 : memref<1x128xf32, #tpu.memory_space<vmem>>) target_semaphore(%14 : memref<!tpu.dma_semaphore, #tpu.memory_space<semaphore_mem>>)
    %c2_i32 = arith.constant 2 : i32
    %15 = arith.addi %0, %c2_i32 : i32
    %16 = arith.index_cast %15 : i32 to index
    %17 = memref.load %arg1[%16] : memref<24xi32, #tpu.memory_space<smem>>
    %c2_i32_8 = arith.constant 2 : i32
    %c0_i32_9 = arith.constant 0 : i32
    %18 = tpu.memref_slice %arg3[%17, %c0_i32_9] : memref<128x128xf32, #tpu.memory_space<any>> -> memref<1x128xf32, #tpu.memory_space<any>>
    %c2_i32_10 = arith.constant 2 : i32
    %c0_i32_11 = arith.constant 0 : i32
    %19 = tpu.memref_slice %arg5[%c2_i32_10, %c0_i32_11] : memref<8x128xf32, #tpu.memory_space<vmem>> -> memref<1x128xf32, #tpu.memory_space<vmem>>
    %20 = tpu.memref_slice %arg6[%c2_i32_8] : memref<4x!tpu.dma_semaphore, #tpu.memory_space<semaphore_mem>> -> memref<1x!tpu.dma_semaphore, #tpu.memory_space<semaphore_mem>>
    %21 = tpu.memref_squeeze %20 : memref<1x!tpu.dma_semaphore, #tpu.memory_space<semaphore_mem>> -> memref<!tpu.dma_semaphore, #tpu.memory_space<semaphore_mem>>
    tpu.enqueue_dma source(%18 : memref<1x128xf32, #tpu.memory_space<any>>) target(%19 : memref<1x128xf32, #tpu.memory_space<vmem>>) target_semaphore(%21 : memref<!tpu.dma_semaphore, #tpu.memory_space<semaphore_mem>>)
    %c3_i32 = arith.constant 3 : i32
    %22 = arith.addi %0, %c3_i32 : i32
    %23 = arith.index_cast %22 : i32 to index
    %24 = memref.load %arg1[%23] : memref<24xi32, #tpu.memory_space<smem>>
    %c3_i32_12 = arith.constant 3 : i32
    %c0_i32_13 = arith.constant 0 : i32
    %25 = tpu.memref_slice %arg3[%24, %c0_i32_13] : memref<128x128xf32, #tpu.memory_space<any>> -> memref<1x128xf32, #tpu.memory_space<any>>
    %c3_i32_14 = arith.constant 3 : i32
    %c0_i32_15 = arith.constant 0 : i32
    %26 = tpu.memref_slice %arg5[%c3_i32_14, %c0_i32_15] : memref<8x128xf32, #tpu.memory_space<vmem>> -> memref<1x128xf32, #tpu.memory_space<vmem>>
    %27 = tpu.memref_slice %arg6[%c3_i32_12] : memref<4x!tpu.dma_semaphore, #tpu.memory_space<semaphore_mem>> -> memref<1x!tpu.dma_semaphore, #tpu.memory_space<semaphore_mem>>
    %28 = tpu.memref_squeeze %27 : memref<1x!tpu.dma_semaphore, #tpu.memory_space<semaphore_mem>> -> memref<!tpu.dma_semaphore, #tpu.memory_space<semaphore_mem>>
    tpu.enqueue_dma source(%25 : memref<1x128xf32, #tpu.memory_space<any>>) target(%26 : memref<1x128xf32, #tpu.memory_space<vmem>>) target_semaphore(%28 : memref<!tpu.dma_semaphore, #tpu.memory_space<semaphore_mem>>)
    %c4_i32 = arith.constant 4 : i32
    %c4_i32_16 = arith.constant 4 : i32
    %29 = arith.addi %c4_i32, %c4_i32_16 : i32
    %c1_i32_17 = arith.constant 1 : i32
    scf.for %arg8 = %c4_i32 to %29 step %c1_i32_17  : i32 {
      %c3_i32_87 = arith.constant 3 : i32
      %124 = arith.andi %arg8, %c3_i32_87 : i32
      %c4_i32_88 = arith.constant 4 : i32
      %125 = arith.subi %arg8, %c4_i32_88 : i32
      %126 = arith.addi %0, %125 : i32
      %127 = arith.index_cast %126 : i32 to index
      %128 = memref.load %arg1[%127] : memref<24xi32, #tpu.memory_space<smem>>
      %c0_i32_89 = arith.constant 0 : i32
      %129 = tpu.memref_slice %arg3[%128, %c0_i32_89] : memref<128x128xf32, #tpu.memory_space<any>> -> memref<1x128xf32, #tpu.memory_space<any>>
      %c0_i32_90 = arith.constant 0 : i32
      %130 = tpu.memref_slice %arg5[%125, %c0_i32_90] : memref<8x128xf32, #tpu.memory_space<vmem>> -> memref<1x128xf32, #tpu.memory_space<vmem>>
      %131 = tpu.memref_slice %arg6[%124] : memref<4x!tpu.dma_semaphore, #tpu.memory_space<semaphore_mem>> -> memref<1x!tpu.dma_semaphore, #tpu.memory_space<semaphore_mem>>
      %132 = tpu.memref_squeeze %131 : memref<1x!tpu.dma_semaphore, #tpu.memory_space<semaphore_mem>> -> memref<!tpu.dma_semaphore, #tpu.memory_space<semaphore_mem>>
      tpu.wait_dma2 semaphore(%132 : memref<!tpu.dma_semaphore, #tpu.memory_space<semaphore_mem>>) src(%129 : memref<1x128xf32, #tpu.memory_space<any>>) dst(%130 : memref<1x128xf32, #tpu.memory_space<vmem>>)
      %133 = arith.addi %0, %arg8 : i32
      %134 = arith.index_cast %133 : i32 to index
      %135 = memref.load %arg1[%134] : memref<24xi32, #tpu.memory_space<smem>>
      %c0_i32_91 = arith.constant 0 : i32
      %136 = tpu.memref_slice %arg3[%135, %c0_i32_91] : memref<128x128xf32, #tpu.memory_space<any>> -> memref<1x128xf32, #tpu.memory_space<any>>
      %c0_i32_92 = arith.constant 0 : i32
      %137 = tpu.memref_slice %arg5[%arg8, %c0_i32_92] : memref<8x128xf32, #tpu.memory_space<vmem>> -> memref<1x128xf32, #tpu.memory_space<vmem>>
      %138 = tpu.memref_slice %arg6[%124] : memref<4x!tpu.dma_semaphore, #tpu.memory_space<semaphore_mem>> -> memref<1x!tpu.dma_semaphore, #tpu.memory_space<semaphore_mem>>
      %139 = tpu.memref_squeeze %138 : memref<1x!tpu.dma_semaphore, #tpu.memory_space<semaphore_mem>> -> memref<!tpu.dma_semaphore, #tpu.memory_space<semaphore_mem>>
      tpu.enqueue_dma source(%136 : memref<1x128xf32, #tpu.memory_space<any>>) target(%137 : memref<1x128xf32, #tpu.memory_space<vmem>>) target_semaphore(%139 : memref<!tpu.dma_semaphore, #tpu.memory_space<semaphore_mem>>)
    }
    %c4_i32_18 = arith.constant 4 : i32
    %c4_i32_19 = arith.constant 4 : i32
    %30 = arith.addi %0, %c4_i32_19 : i32
    %31 = arith.index_cast %30 : i32 to index
    %32 = memref.load %arg1[%31] : memref<24xi32, #tpu.memory_space<smem>>
    %c0_i32_20 = arith.constant 0 : i32
    %c0_i32_21 = arith.constant 0 : i32
    %33 = tpu.memref_slice %arg3[%32, %c0_i32_21] : memref<128x128xf32, #tpu.memory_space<any>> -> memref<1x128xf32, #tpu.memory_space<any>>
    %c4_i32_22 = arith.constant 4 : i32
    %c0_i32_23 = arith.constant 0 : i32
    %34 = tpu.memref_slice %arg5[%c4_i32_22, %c0_i32_23] : memref<8x128xf32, #tpu.memory_space<vmem>> -> memref<1x128xf32, #tpu.memory_space<vmem>>
    %35 = tpu.memref_slice %arg6[%c0_i32_20] : memref<4x!tpu.dma_semaphore, #tpu.memory_space<semaphore_mem>> -> memref<1x!tpu.dma_semaphore, #tpu.memory_space<semaphore_mem>>
    %36 = tpu.memref_squeeze %35 : memref<1x!tpu.dma_semaphore, #tpu.memory_space<semaphore_mem>> -> memref<!tpu.dma_semaphore, #tpu.memory_space<semaphore_mem>>
    tpu.wait_dma2 semaphore(%36 : memref<!tpu.dma_semaphore, #tpu.memory_space<semaphore_mem>>) src(%33 : memref<1x128xf32, #tpu.memory_space<any>>) dst(%34 : memref<1x128xf32, #tpu.memory_space<vmem>>)
    %c5_i32 = arith.constant 5 : i32
    %37 = arith.addi %0, %c5_i32 : i32
    %38 = arith.index_cast %37 : i32 to index
    %39 = memref.load %arg1[%38] : memref<24xi32, #tpu.memory_space<smem>>
    %c1_i32_24 = arith.constant 1 : i32
    %c0_i32_25 = arith.constant 0 : i32
    %40 = tpu.memref_slice %arg3[%39, %c0_i32_25] : memref<128x128xf32, #tpu.memory_space<any>> -> memref<1x128xf32, #tpu.memory_space<any>>
    %c5_i32_26 = arith.constant 5 : i32
    %c0_i32_27 = arith.constant 0 : i32
    %41 = tpu.memref_slice %arg5[%c5_i32_26, %c0_i32_27] : memref<8x128xf32, #tpu.memory_space<vmem>> -> memref<1x128xf32, #tpu.memory_space<vmem>>
    %42 = tpu.memref_slice %arg6[%c1_i32_24] : memref<4x!tpu.dma_semaphore, #tpu.memory_space<semaphore_mem>> -> memref<1x!tpu.dma_semaphore, #tpu.memory_space<semaphore_mem>>
    %43 = tpu.memref_squeeze %42 : memref<1x!tpu.dma_semaphore, #tpu.memory_space<semaphore_mem>> -> memref<!tpu.dma_semaphore, #tpu.memory_space<semaphore_mem>>
    tpu.wait_dma2 semaphore(%43 : memref<!tpu.dma_semaphore, #tpu.memory_space<semaphore_mem>>) src(%40 : memref<1x128xf32, #tpu.memory_space<any>>) dst(%41 : memref<1x128xf32, #tpu.memory_space<vmem>>)
    %c6_i32 = arith.constant 6 : i32
    %44 = arith.addi %0, %c6_i32 : i32
    %45 = arith.index_cast %44 : i32 to index
    %46 = memref.load %arg1[%45] : memref<24xi32, #tpu.memory_space<smem>>
    %c2_i32_28 = arith.constant 2 : i32
    %c0_i32_29 = arith.constant 0 : i32
    %47 = tpu.memref_slice %arg3[%46, %c0_i32_29] : memref<128x128xf32, #tpu.memory_space<any>> -> memref<1x128xf32, #tpu.memory_space<any>>
    %c6_i32_30 = arith.constant 6 : i32
    %c0_i32_31 = arith.constant 0 : i32
    %48 = tpu.memref_slice %arg5[%c6_i32_30, %c0_i32_31] : memref<8x128xf32, #tpu.memory_space<vmem>> -> memref<1x128xf32, #tpu.memory_space<vmem>>
    %49 = tpu.memref_slice %arg6[%c2_i32_28] : memref<4x!tpu.dma_semaphore, #tpu.memory_space<semaphore_mem>> -> memref<1x!tpu.dma_semaphore, #tpu.memory_space<semaphore_mem>>
    %50 = tpu.memref_squeeze %49 : memref<1x!tpu.dma_semaphore, #tpu.memory_space<semaphore_mem>> -> memref<!tpu.dma_semaphore, #tpu.memory_space<semaphore_mem>>
    tpu.wait_dma2 semaphore(%50 : memref<!tpu.dma_semaphore, #tpu.memory_space<semaphore_mem>>) src(%47 : memref<1x128xf32, #tpu.memory_space<any>>) dst(%48 : memref<1x128xf32, #tpu.memory_space<vmem>>)
    %c7_i32 = arith.constant 7 : i32
    %51 = arith.addi %0, %c7_i32 : i32
    %52 = arith.index_cast %51 : i32 to index
    %53 = memref.load %arg1[%52] : memref<24xi32, #tpu.memory_space<smem>>
    %c3_i32_32 = arith.constant 3 : i32
    %c0_i32_33 = arith.constant 0 : i32
    %54 = tpu.memref_slice %arg3[%53, %c0_i32_33] : memref<128x128xf32, #tpu.memory_space<any>> -> memref<1x128xf32, #tpu.memory_space<any>>
    %c7_i32_34 = arith.constant 7 : i32
    %c0_i32_35 = arith.constant 0 : i32
    %55 = tpu.memref_slice %arg5[%c7_i32_34, %c0_i32_35] : memref<8x128xf32, #tpu.memory_space<vmem>> -> memref<1x128xf32, #tpu.memory_space<vmem>>
    %56 = tpu.memref_slice %arg6[%c3_i32_32] : memref<4x!tpu.dma_semaphore, #tpu.memory_space<semaphore_mem>> -> memref<1x!tpu.dma_semaphore, #tpu.memory_space<semaphore_mem>>
    %57 = tpu.memref_squeeze %56 : memref<1x!tpu.dma_semaphore, #tpu.memory_space<semaphore_mem>> -> memref<!tpu.dma_semaphore, #tpu.memory_space<semaphore_mem>>
    tpu.wait_dma2 semaphore(%57 : memref<!tpu.dma_semaphore, #tpu.memory_space<semaphore_mem>>) src(%54 : memref<1x128xf32, #tpu.memory_space<any>>) dst(%55 : memref<1x128xf32, #tpu.memory_space<vmem>>)
    %c0 = arith.constant 0 : index
    %c0_36 = arith.constant 0 : index
    %58 = vector.load %arg2[%c0, %c0_36] : memref<8x128xf32, #tpu.memory_space<vmem>>, vector<8x128xf32>
    %cst = arith.constant 2.500000e-01 : f32
    %59 = vector.broadcast %cst : f32 to vector<8x128xf32>
    %60 = arith.mulf %59, %58 : vector<8x128xf32>
    %cst_37 = arith.constant 1.000000e+00 : f32
    %cst_38 = arith.constant 2.500000e-01 : f32
    %61 = arith.subf %cst_37, %cst_38 : f32
    %c0_39 = arith.constant 0 : index
    %c0_40 = arith.constant 0 : index
    %62 = vector.load %arg5[%c0_39, %c0_40] : memref<8x128xf32, #tpu.memory_space<vmem>>, vector<8x128xf32>
    %63 = vector.broadcast %61 : f32 to vector<8x128xf32>
    %64 = arith.mulf %63, %62 : vector<8x128xf32>
    %65 = arith.addf %60, %64 : vector<8x128xf32>
    %c0_41 = arith.constant 0 : index
    %c0_42 = arith.constant 0 : index
    %66 = vector.load %arg5[%c0_41, %c0_42] : memref<8x128xf32, #tpu.memory_space<vmem>>, vector<8x128xf32>
    tpu.vector_store %arg5[%c0_41, %c0_42], %65 {strides = array<i32>} : memref<8x128xf32, #tpu.memory_space<vmem>>, vector<8x128xf32>,
    %c0_i32_43 = arith.constant 0 : i32
    %67 = arith.addi %0, %c0_i32_43 : i32
    %68 = arith.index_cast %67 : i32 to index
    %69 = memref.load %arg1[%68] : memref<24xi32, #tpu.memory_space<smem>>
    %c0_i32_44 = arith.constant 0 : i32
    %c0_i32_45 = arith.constant 0 : i32
    %c0_i32_46 = arith.constant 0 : i32
    %70 = tpu.memref_slice %arg5[%c0_i32_45, %c0_i32_46] : memref<8x128xf32, #tpu.memory_space<vmem>> -> memref<1x128xf32, #tpu.memory_space<vmem>>
    %c0_i32_47 = arith.constant 0 : i32
    %71 = tpu.memref_slice %arg4[%69, %c0_i32_47] : memref<128x128xf32, #tpu.memory_space<any>> -> memref<1x128xf32, #tpu.memory_space<any>>
    %72 = tpu.memref_slice %arg7[%c0_i32_44] : memref<4x!tpu.dma_semaphore, #tpu.memory_space<semaphore_mem>> -> memref<1x!tpu.dma_semaphore, #tpu.memory_space<semaphore_mem>>
    %73 = tpu.memref_squeeze %72 : memref<1x!tpu.dma_semaphore, #tpu.memory_space<semaphore_mem>> -> memref<!tpu.dma_semaphore, #tpu.memory_space<semaphore_mem>>
    tpu.enqueue_dma source(%70 : memref<1x128xf32, #tpu.memory_space<vmem>>) target(%71 : memref<1x128xf32, #tpu.memory_space<any>>) target_semaphore(%73 : memref<!tpu.dma_semaphore, #tpu.memory_space<semaphore_mem>>)
    %c1_i32_48 = arith.constant 1 : i32
    %74 = arith.addi %0, %c1_i32_48 : i32
    %75 = arith.index_cast %74 : i32 to index
    %76 = memref.load %arg1[%75] : memref<24xi32, #tpu.memory_space<smem>>
    %c1_i32_49 = arith.constant 1 : i32
    %c1_i32_50 = arith.constant 1 : i32
    %c0_i32_51 = arith.constant 0 : i32
    %77 = tpu.memref_slice %arg5[%c1_i32_50, %c0_i32_51] : memref<8x128xf32, #tpu.memory_space<vmem>> -> memref<1x128xf32, #tpu.memory_space<vmem>>
    %c0_i32_52 = arith.constant 0 : i32
    %78 = tpu.memref_slice %arg4[%76, %c0_i32_52] : memref<128x128xf32, #tpu.memory_space<any>> -> memref<1x128xf32, #tpu.memory_space<any>>
    %79 = tpu.memref_slice %arg7[%c1_i32_49] : memref<4x!tpu.dma_semaphore, #tpu.memory_space<semaphore_mem>> -> memref<1x!tpu.dma_semaphore, #tpu.memory_space<semaphore_mem>>
    %80 = tpu.memref_squeeze %79 : memref<1x!tpu.dma_semaphore, #tpu.memory_space<semaphore_mem>> -> memref<!tpu.dma_semaphore, #tpu.memory_space<semaphore_mem>>
    tpu.enqueue_dma source(%77 : memref<1x128xf32, #tpu.memory_space<vmem>>) target(%78 : memref<1x128xf32, #tpu.memory_space<any>>) target_semaphore(%80 : memref<!tpu.dma_semaphore, #tpu.memory_space<semaphore_mem>>)
    %c2_i32_53 = arith.constant 2 : i32
    %81 = arith.addi %0, %c2_i32_53 : i32
    %82 = arith.index_cast %81 : i32 to index
    %83 = memref.load %arg1[%82] : memref<24xi32, #tpu.memory_space<smem>>
    %c2_i32_54 = arith.constant 2 : i32
    %c2_i32_55 = arith.constant 2 : i32
    %c0_i32_56 = arith.constant 0 : i32
    %84 = tpu.memref_slice %arg5[%c2_i32_55, %c0_i32_56] : memref<8x128xf32, #tpu.memory_space<vmem>> -> memref<1x128xf32, #tpu.memory_space<vmem>>
    %c0_i32_57 = arith.constant 0 : i32
    %85 = tpu.memref_slice %arg4[%83, %c0_i32_57] : memref<128x128xf32, #tpu.memory_space<any>> -> memref<1x128xf32, #tpu.memory_space<any>>
    %86 = tpu.memref_slice %arg7[%c2_i32_54] : memref<4x!tpu.dma_semaphore, #tpu.memory_space<semaphore_mem>> -> memref<1x!tpu.dma_semaphore, #tpu.memory_space<semaphore_mem>>
    %87 = tpu.memref_squeeze %86 : memref<1x!tpu.dma_semaphore, #tpu.memory_space<semaphore_mem>> -> memref<!tpu.dma_semaphore, #tpu.memory_space<semaphore_mem>>
    tpu.enqueue_dma source(%84 : memref<1x128xf32, #tpu.memory_space<vmem>>) target(%85 : memref<1x128xf32, #tpu.memory_space<any>>) target_semaphore(%87 : memref<!tpu.dma_semaphore, #tpu.memory_space<semaphore_mem>>)
    %c3_i32_58 = arith.constant 3 : i32
    %88 = arith.addi %0, %c3_i32_58 : i32
    %89 = arith.index_cast %88 : i32 to index
    %90 = memref.load %arg1[%89] : memref<24xi32, #tpu.memory_space<smem>>
    %c3_i32_59 = arith.constant 3 : i32
    %c3_i32_60 = arith.constant 3 : i32
    %c0_i32_61 = arith.constant 0 : i32
    %91 = tpu.memref_slice %arg5[%c3_i32_60, %c0_i32_61] : memref<8x128xf32, #tpu.memory_space<vmem>> -> memref<1x128xf32, #tpu.memory_space<vmem>>
    %c0_i32_62 = arith.constant 0 : i32
    %92 = tpu.memref_slice %arg4[%90, %c0_i32_62] : memref<128x128xf32, #tpu.memory_space<any>> -> memref<1x128xf32, #tpu.memory_space<any>>
    %93 = tpu.memref_slice %arg7[%c3_i32_59] : memref<4x!tpu.dma_semaphore, #tpu.memory_space<semaphore_mem>> -> memref<1x!tpu.dma_semaphore, #tpu.memory_space<semaphore_mem>>
    %94 = tpu.memref_squeeze %93 : memref<1x!tpu.dma_semaphore, #tpu.memory_space<semaphore_mem>> -> memref<!tpu.dma_semaphore, #tpu.memory_space<semaphore_mem>>
    tpu.enqueue_dma source(%91 : memref<1x128xf32, #tpu.memory_space<vmem>>) target(%92 : memref<1x128xf32, #tpu.memory_space<any>>) target_semaphore(%94 : memref<!tpu.dma_semaphore, #tpu.memory_space<semaphore_mem>>)
    %c4_i32_63 = arith.constant 4 : i32
    %c4_i32_64 = arith.constant 4 : i32
    %95 = arith.addi %c4_i32_63, %c4_i32_64 : i32
    %c1_i32_65 = arith.constant 1 : i32
    scf.for %arg8 = %c4_i32_63 to %95 step %c1_i32_65  : i32 {
      %c3_i32_87 = arith.constant 3 : i32
      %124 = arith.andi %arg8, %c3_i32_87 : i32
      %c4_i32_88 = arith.constant 4 : i32
      %125 = arith.subi %arg8, %c4_i32_88 : i32
      %126 = arith.addi %0, %125 : i32
      %127 = arith.index_cast %126 : i32 to index
      %128 = memref.load %arg1[%127] : memref<24xi32, #tpu.memory_space<smem>>
      %c0_i32_89 = arith.constant 0 : i32
      %129 = tpu.memref_slice %arg5[%125, %c0_i32_89] : memref<8x128xf32, #tpu.memory_space<vmem>> -> memref<1x128xf32, #tpu.memory_space<vmem>>
      %c0_i32_90 = arith.constant 0 : i32
      %130 = tpu.memref_slice %arg4[%128, %c0_i32_90] : memref<128x128xf32, #tpu.memory_space<any>> -> memref<1x128xf32, #tpu.memory_space<any>>
      %131 = tpu.memref_slice %arg7[%124] : memref<4x!tpu.dma_semaphore, #tpu.memory_space<semaphore_mem>> -> memref<1x!tpu.dma_semaphore, #tpu.memory_space<semaphore_mem>>
      %132 = tpu.memref_squeeze %131 : memref<1x!tpu.dma_semaphore, #tpu.memory_space<semaphore_mem>> -> memref<!tpu.dma_semaphore, #tpu.memory_space<semaphore_mem>>
      tpu.wait_dma2 semaphore(%132 : memref<!tpu.dma_semaphore, #tpu.memory_space<semaphore_mem>>) src(%129 : memref<1x128xf32, #tpu.memory_space<vmem>>) dst(%130 : memref<1x128xf32, #tpu.memory_space<any>>)
      %133 = arith.addi %0, %arg8 : i32
      %134 = arith.index_cast %133 : i32 to index
      %135 = memref.load %arg1[%134] : memref<24xi32, #tpu.memory_space<smem>>
      %c0_i32_91 = arith.constant 0 : i32
      %136 = tpu.memref_slice %arg5[%arg8, %c0_i32_91] : memref<8x128xf32, #tpu.memory_space<vmem>> -> memref<1x128xf32, #tpu.memory_space<vmem>>
      %c0_i32_92 = arith.constant 0 : i32
      %137 = tpu.memref_slice %arg4[%135, %c0_i32_92] : memref<128x128xf32, #tpu.memory_space<any>> -> memref<1x128xf32, #tpu.memory_space<any>>
      %138 = tpu.memref_slice %arg7[%124] : memref<4x!tpu.dma_semaphore, #tpu.memory_space<semaphore_mem>> -> memref<1x!tpu.dma_semaphore, #tpu.memory_space<semaphore_mem>>
      %139 = tpu.memref_squeeze %138 : memref<1x!tpu.dma_semaphore, #tpu.memory_space<semaphore_mem>> -> memref<!tpu.dma_semaphore, #tpu.memory_space<semaphore_mem>>
      tpu.enqueue_dma source(%136 : memref<1x128xf32, #tpu.memory_space<vmem>>) target(%137 : memref<1x128xf32, #tpu.memory_space<any>>) target_semaphore(%139 : memref<!tpu.dma_semaphore, #tpu.memory_space<semaphore_mem>>)
    }
    %c4_i32_66 = arith.constant 4 : i32
    %c4_i32_67 = arith.constant 4 : i32
    %96 = arith.addi %0, %c4_i32_67 : i32
    %97 = arith.index_cast %96 : i32 to index
    %98 = memref.load %arg1[%97] : memref<24xi32, #tpu.memory_space<smem>>
    %c0_i32_68 = arith.constant 0 : i32
    %c4_i32_69 = arith.constant 4 : i32
    %c0_i32_70 = arith.constant 0 : i32
    %99 = tpu.memref_slice %arg5[%c4_i32_69, %c0_i32_70] : memref<8x128xf32, #tpu.memory_space<vmem>> -> memref<1x128xf32, #tpu.memory_space<vmem>>
    %c0_i32_71 = arith.constant 0 : i32
    %100 = tpu.memref_slice %arg4[%98, %c0_i32_71] : memref<128x128xf32, #tpu.memory_space<any>> -> memref<1x128xf32, #tpu.memory_space<any>>
    %101 = tpu.memref_slice %arg7[%c0_i32_68] : memref<4x!tpu.dma_semaphore, #tpu.memory_space<semaphore_mem>> -> memref<1x!tpu.dma_semaphore, #tpu.memory_space<semaphore_mem>>
    %102 = tpu.memref_squeeze %101 : memref<1x!tpu.dma_semaphore, #tpu.memory_space<semaphore_mem>> -> memref<!tpu.dma_semaphore, #tpu.memory_space<semaphore_mem>>
    tpu.wait_dma2 semaphore(%102 : memref<!tpu.dma_semaphore, #tpu.memory_space<semaphore_mem>>) src(%99 : memref<1x128xf32, #tpu.memory_space<vmem>>) dst(%100 : memref<1x128xf32, #tpu.memory_space<any>>)
    %c5_i32_72 = arith.constant 5 : i32
    %103 = arith.addi %0, %c5_i32_72 : i32
    %104 = arith.index_cast %103 : i32 to index
    %105 = memref.load %arg1[%104] : memref<24xi32, #tpu.memory_space<smem>>
    %c1_i32_73 = arith.constant 1 : i32
    %c5_i32_74 = arith.constant 5 : i32
    %c0_i32_75 = arith.constant 0 : i32
    %106 = tpu.memref_slice %arg5[%c5_i32_74, %c0_i32_75] : memref<8x128xf32, #tpu.memory_space<vmem>> -> memref<1x128xf32, #tpu.memory_space<vmem>>
    %c0_i32_76 = arith.constant 0 : i32
    %107 = tpu.memref_slice %arg4[%105, %c0_i32_76] : memref<128x128xf32, #tpu.memory_space<any>> -> memref<1x128xf32, #tpu.memory_space<any>>
    %108 = tpu.memref_slice %arg7[%c1_i32_73] : memref<4x!tpu.dma_semaphore, #tpu.memory_space<semaphore_mem>> -> memref<1x!tpu.dma_semaphore, #tpu.memory_space<semaphore_mem>>
    %109 = tpu.memref_squeeze %108 : memref<1x!tpu.dma_semaphore, #tpu.memory_space<semaphore_mem>> -> memref<!tpu.dma_semaphore, #tpu.memory_space<semaphore_mem>>
    tpu.wait_dma2 semaphore(%109 : memref<!tpu.dma_semaphore, #tpu.memory_space<semaphore_mem>>) src(%106 : memref<1x128xf32, #tpu.memory_space<vmem>>) dst(%107 : memref<1x128xf32, #tpu.memory_space<any>>)
    %c6_i32_77 = arith.constant 6 : i32
    %110 = arith.addi %0, %c6_i32_77 : i32
    %111 = arith.index_cast %110 : i32 to index
    %112 = memref.load %arg1[%111] : memref<24xi32, #tpu.memory_space<smem>>
    %c2_i32_78 = arith.constant 2 : i32
    %c6_i32_79 = arith.constant 6 : i32
    %c0_i32_80 = arith.constant 0 : i32
    %113 = tpu.memref_slice %arg5[%c6_i32_79, %c0_i32_80] : memref<8x128xf32, #tpu.memory_space<vmem>> -> memref<1x128xf32, #tpu.memory_space<vmem>>
    %c0_i32_81 = arith.constant 0 : i32
    %114 = tpu.memref_slice %arg4[%112, %c0_i32_81] : memref<128x128xf32, #tpu.memory_space<any>> -> memref<1x128xf32, #tpu.memory_space<any>>
    %115 = tpu.memref_slice %arg7[%c2_i32_78] : memref<4x!tpu.dma_semaphore, #tpu.memory_space<semaphore_mem>> -> memref<1x!tpu.dma_semaphore, #tpu.memory_space<semaphore_mem>>
    %116 = tpu.memref_squeeze %115 : memref<1x!tpu.dma_semaphore, #tpu.memory_space<semaphore_mem>> -> memref<!tpu.dma_semaphore, #tpu.memory_space<semaphore_mem>>
    tpu.wait_dma2 semaphore(%116 : memref<!tpu.dma_semaphore, #tpu.memory_space<semaphore_mem>>) src(%113 : memref<1x128xf32, #tpu.memory_space<vmem>>) dst(%114 : memref<1x128xf32, #tpu.memory_space<any>>)
    %c7_i32_82 = arith.constant 7 : i32
    %117 = arith.addi %0, %c7_i32_82 : i32
    %118 = arith.index_cast %117 : i32 to index
    %119 = memref.load %arg1[%118] : memref<24xi32, #tpu.memory_space<smem>>
    %c3_i32_83 = arith.constant 3 : i32
    %c7_i32_84 = arith.constant 7 : i32
    %c0_i32_85 = arith.constant 0 : i32
    %120 = tpu.memref_slice %arg5[%c7_i32_84, %c0_i32_85] : memref<8x128xf32, #tpu.memory_space<vmem>> -> memref<1x128xf32, #tpu.memory_space<vmem>>
    %c0_i32_86 = arith.constant 0 : i32
    %121 = tpu.memref_slice %arg4[%119, %c0_i32_86] : memref<128x128xf32, #tpu.memory_space<any>> -> memref<1x128xf32, #tpu.memory_space<any>>
    %122 = tpu.memref_slice %arg7[%c3_i32_83] : memref<4x!tpu.dma_semaphore, #tpu.memory_space<semaphore_mem>> -> memref<1x!tpu.dma_semaphore, #tpu.memory_space<semaphore_mem>>
    %123 = tpu.memref_squeeze %122 : memref<1x!tpu.dma_semaphore, #tpu.memory_space<semaphore_mem>> -> memref<!tpu.dma_semaphore, #tpu.memory_space<semaphore_mem>>
    tpu.wait_dma2 semaphore(%123 : memref<!tpu.dma_semaphore, #tpu.memory_space<semaphore_mem>>) src(%120 : memref<1x128xf32, #tpu.memory_space<vmem>>) dst(%121 : memref<1x128xf32, #tpu.memory_space<any>>)
    return
  }
  func.func @transform_0(%arg0: i32, %arg1: memref<24xi32, #tpu.memory_space<smem>>) -> (i32, i32) {
    %c0_i32 = arith.constant 0 : i32
    %c0_i32_0 = arith.constant 0 : i32
    return %arg0, %c0_i32 : i32, i32
  }
}

</mosaic_0001>

<bundles_post_ra>
// kernel: tpu_custom_call.1
= control target key start
LH: loop header
LB: loop body
LE: loop exit
PB: predicated region body
PF: predicated region fallthrough
CT: control target
= control target key end

     0   :  { %s1064_s0 = inlined_call_operand.vmem [shape: s32[24], index: 0, kind: input, shape index: {}]   ;;  %s1065_s1 = inlined_call_operand.vmem [shape: f32[24,128], index: 1, kind: input, shape index: {}]   ;;  %s1066_s2 = inlined_call_operand.hbm [shape: f32[128,128], index: 2, kind: input, shape index: {}, may-alias: {2,3}]   ;;  %s1067_s3 = inlined_call_operand.hbm [shape: f32[128,128], index: 3, kind: output, shape index: {}, may-alias: {2,3}]  }
   0x1   :  { %1085 = sst [smem:[#allocation43_spill]] %s1065_s1  ;;  %s8_s14 = sshll.u32 %s1064_s0, 4  ;;  %s9_s14 = int_to_ptr.vmem [resolvable:$true] %s8_s14 }
   0x2   :  { %1086 = sst [smem:[#allocation44_spill]] %s1066_s2  ;;  %s451_s15 = scalar_lea.vmem %s9_s14, 16 }
   0x3   :  { %p452_p0 = scmp.ne.s32.totalorder %s9_s14, %s451_s15  ;;  %p456_p1 = scmp.lt.s32.totalorder %s9_s14, %s9_s14 }
   0x4   :  { %p457_p2 = scmp.lt.s32.totalorder %s451_s15, %s451_s15 }
   0x6   :  { %p458_p3 = por %p457_p2, %p456_p1 }
   0x8   :  { %p459_p4 = pnand %p458_p3, %p452_p0 }
   0xa   :  { %462 = shalt.err (!%p459_p4)  }
   0xb   :  { %s749_s16 = smov [#allocation6]  }
   0xc   :  { %11 = dma.vmem_to_smem %s9_s14, 16, %s749_s16, [#allocation5] }
   0xd   :  { %715 = dma.done.wait [#allocation5], 16 }
   0xe   :  { %716 = vsyncadd [#allocation5], 4294967280 }
   0xf   :  { %13 = sfence }
  0x10   :  { %s777_s17 = smov 0  }
  0x11 LB: > { %1087 = sst [smem:[#allocation40_spill]] %s739_s17  ;;  %s396_s0 = sadd.s32 4294967295, %s739_s17   ;;  %s739_s17 = sphi %s777_s17, %s19_s17  }
  0x12   : > { %p401_p5 = scmp.lt.s32.totalorder %s739_s17, 1 }
  0x14   : > { %60 = sbr.rel (%p401_p5) target bundleno = 301 (0x12d), region = 24 }
  0x1b   : > { %p68_p6 = scmp.lt.s32.totalorder %s396_s0, 2  ;;  %s784_s18 = sshll.u32 %s396_s0, 3 }
  0x1c   : > { %1088 = sst [smem:[#allocation41_spill]] %s784_s18  ;;  %s750_s20 = smov [#allocation2]  }
  0x1d   : > { %s73_s19 = sld [smem:[#allocation6 + %s784_s18]]  ;;  %s1119_s0 = smov (!%p68_p6, %s396_s0), 2 }
  0x1e   : > { %s83_s21 = sshll.u32 %s750_s20, 4  ;;  %s1076_s22 = sadd.s32 1, %s784_s18  ;;  %s788_s21 = int_to_ptr.vmem [resolvable:$true] %s83_s21 }
  0x1f   : > { %s402_s23 = sshll.u32 %s1119_s0, 3  ;;  %s1089_s1 = sld [smem:[#allocation43_spill]] }
  0x20   : > { %s797_s27 = sld [smem:[#allocation6 + %s1076_s22]]  ;;  %s1075_s28 = sadd.s32 2, %s784_s18 }
  0x21   : > { %s751_s30 = smov [#allocation2 + $0x1]   ;;  %s1090_s2 = sld [smem:[#allocation44_spill]] }
  0x22   : > { %s100_s4 = sshll.u32 %s751_s30, 4  ;;  %s803_s4 = int_to_ptr.vmem [resolvable:$true] %s100_s4 }
  0x23   : > { %s404_s29 = sshll.u32 %s73_s19, 4 }
  0x25   : > { %s793_s26 = scalar_lea.vmem %s1089_s1, %s402_s23 }
  0x27   : > { %s75_s7 = scalar_lea.hbm %s1090_s2, %s404_s29  ;;  %s808_s11 = scalar_lea.hbm %s1090_s2, 2048 }
  0x28   : > { %s463_s8 = scalar_lea.hbm %s75_s7, 16  ;;  %p466_p8 = scmp.lt.u32.totalorder %s75_s7, %s1090_s2 }
  0x29   : > { %p464_p7 = scmp.ne.s32.totalorder %s75_s7, %s463_s8  ;;  %p467_p9 = scmp.lt.u32.totalorder %s808_s11, %s463_s8 }
  0x2a   : > { %p469_p11 = scmp.lt.u32.totalorder %s463_s8, %s75_s7 }
  0x2b   : > { %p468_p10 = por %p467_p9, %p466_p8 }
  0x2d   : > { %p470_p12 = por %p469_p11, %p468_p10 }
  0x2f   : > { %p471_p13 = pnand %p470_p12, %p464_p7 }
  0x31   : > { %474 = shalt.err (!%p471_p13)  }
  0x32   : > { %s475_s14 = scalar_lea.vmem %s788_s21, 16  ;;  %s821_s16 = scalar_lea.vmem %s788_s21, 128 }
  0x33   : > { %p816_p0 = scmp.ne.s32.totalorder %s788_s21, %s475_s14  ;;  %1092 = sst [smem:[#allocation42_spill]] %s821_s16 }
  0x34   : > { %p480_p1 = scmp.lt.s32.totalorder %s788_s21, %s788_s21  ;;  %p481_p2 = scmp.lt.s32.totalorder %s821_s16, %s475_s14 }
  0x35   : > { %s1091_s15 = scalar_select %p816_p0, 1, 0 }
  0x36   : > { %p826_p3 = por %p481_p2, %p480_p1 }
  0x38   : > { %p1069_p4 = pnand %p826_p3, %p816_p0 }
  0x3a   : > { %486 = shalt.err (!%p1069_p4)  }
  0x3b   : > { %86 = dma.hbm_to_vmem [thread:$0]  %s75_s7, 16, %s788_s21, [#allocation3] }
  0x3c   : > { %s105_s19 = sld [smem:[#allocation6 + %s1075_s28]]  ;;  %s405_s20 = sshll.u32 %s797_s27, 4 }
  0x3d   : > { %s90_s25 = scalar_lea.hbm %s1090_s2, %s405_s20  ;;  %s752_s29 = smov [#allocation2 + $0x2]  }
  0x3e   : > { %s117_s30 = sshll.u32 %s752_s29, 4  ;;  %s487_s5 = scalar_lea.hbm %s90_s25, 16  ;;  %s874_s30 = int_to_ptr.vmem [resolvable:$true] %s117_s30 }
  0x3f   : > { %p488_p5 = scmp.ne.s32.totalorder %s90_s25, %s487_s5  ;;  %p490_p6 = scmp.lt.u32.totalorder %s90_s25, %s1090_s2 }
  0x40   : > { %p491_p7 = scmp.lt.u32.totalorder %s808_s11, %s487_s5  ;;  %p493_p9 = scmp.lt.u32.totalorder %s487_s5, %s90_s25 }
  0x42   : > { %p492_p8 = por %p491_p7, %p490_p6 }
  0x44   : > { %p494_p10 = por %p493_p9, %p492_p8 }
  0x46   : > { %p495_p11 = pnand %p494_p10, %p488_p5 }
  0x48   : > { %498 = shalt.err (!%p495_p11)  }
  0x49   : > { %s499_s27 = scalar_lea.vmem %s803_s4, 16  ;;  %p504_p13 = scmp.lt.s32.totalorder %s803_s4, %s788_s21 }
  0x4a   : > { %p852_p12 = scmp.ne.s32.totalorder %s803_s4, %s499_s27  ;;  %p505_p1 = scmp.lt.s32.totalorder %s821_s16, %s499_s27 }
  0x4c   : > { %s1094_s7 = scalar_select %p852_p12, 1, 0 }
  0x4d   : > { %p859_p2 = por %p505_p1, %p504_p13 }
  0x4f   : > { %s1095_s9 = scalar_select %p859_p2, 1, 0 }
  0x50   : > { %p1068_p5 = pnand %p859_p2, %p852_p12 }
  0x52   : > { %510 = shalt.err (!%p1068_p5)  }
  0x53   : > { %103 = dma.hbm_to_vmem [thread:$0]  %s90_s25, 16, %s803_s4, [#allocation3 + $0x1] }
  0x54   : > { %s1074_s10 = sadd.s32 3, %s784_s18  ;;  %s406_s13 = sshll.u32 %s105_s19, 4 }
  0x55   : > { %s122_s12 = sld [smem:[#allocation6 + %s1074_s10]]  ;;  %s107_s23 = scalar_lea.hbm %s1090_s2, %s406_s13 }
  0x56   : > { %s753_s24 = smov [#allocation2 + $0x3]   ;;  %s511_s5 = scalar_lea.hbm %s107_s23, 16 }
  0x57   : > { %s134_s29 = sshll.u32 %s753_s24, 4  ;;  %p512_p6 = scmp.ne.s32.totalorder %s107_s23, %s511_s5  ;;  %s908_s29 = int_to_ptr.vmem [resolvable:$true] %s134_s29 }
  0x58   : > { %p514_p7 = scmp.lt.u32.totalorder %s107_s23, %s1090_s2  ;;  %p515_p8 = scmp.lt.u32.totalorder %s808_s11, %s511_s5 }
  0x59   : > { %p517_p10 = scmp.lt.u32.totalorder %s511_s5, %s107_s23 }
  0x5a   : > { %p516_p9 = por %p515_p8, %p514_p7 }
  0x5c   : > { %p518_p11 = por %p517_p10, %p516_p9 }
  0x5e   : > { %p519_p13 = pnand %p518_p11, %p512_p6 }
  0x60   : > { %522 = shalt.err (!%p519_p13)  }
  0x61   : > { %s523_s19 = scalar_lea.vmem %s874_s30, 16  ;;  %p528_p5 = scmp.lt.s32.totalorder %s874_s30, %s788_s21 }
  0x62   : > { %p887_p1 = scmp.ne.s32.totalorder %s874_s30, %s523_s19  ;;  %p529_p4 = scmp.lt.s32.totalorder %s821_s16, %s523_s19 }
  0x64   : > { %s1096_s25 = scalar_select %p887_p1, 1, 0 }
  0x65   : > { %p894_p12 = por %p529_p4, %p528_p5 }
  0x67   : > { %s1097_s27 = scalar_select %p894_p12, 1, 0 }
  0x68   : > { %p1071_p6 = pnand %p894_p12, %p887_p1 }
  0x6a   : > { %534 = shalt.err (!%p1071_p6)  }
  0x6b   : > { %120 = dma.hbm_to_vmem [thread:$0]  %s107_s23, 16, %s874_s30, [#allocation3 + $0x2] }
  0x6c   : > { %s407_s13 = sshll.u32 %s122_s12, 4 }
  0x6d   : > { %s124_s24 = scalar_lea.hbm %s1090_s2, %s407_s13 }
  0x6e   : > { %s535_s5 = scalar_lea.hbm %s124_s24, 16  ;;  %p538_p5 = scmp.lt.u32.totalorder %s124_s24, %s1090_s2 }
  0x6f   : > { %p536_p4 = scmp.ne.s32.totalorder %s124_s24, %s535_s5  ;;  %p539_p7 = scmp.lt.u32.totalorder %s808_s11, %s535_s5 }
  0x70   : > { %p541_p9 = scmp.lt.u32.totalorder %s535_s5, %s124_s24 }
  0x71   : > { %p540_p8 = por %p539_p7, %p538_p5 }
  0x73   : > { %p542_p10 = por %p541_p9, %p540_p8 }
  0x75   : > { %p543_p11 = pnand %p542_p10, %p536_p4 }
  0x77   : > { %546 = shalt.err (!%p543_p11)  }
  0x78   : > { %s547_s12 = scalar_lea.vmem %s908_s29, 16  ;;  %p552_p6 = scmp.lt.s32.totalorder %s908_s29, %s788_s21 }
  0x79   : > { %p919_p13 = scmp.ne.s32.totalorder %s908_s29, %s547_s12  ;;  %p553_p1 = scmp.lt.s32.totalorder %s821_s16, %s547_s12 }
  0x7b   : > { %s1098_s23 = scalar_select %p919_p13, 1, 0 }
  0x7c   : > { %p926_p12 = por %p553_p1, %p552_p6 }
  0x7e   : > { %s1099_s19 = scalar_select %p926_p12, 1, 0 }
  0x7f   : > { %p1078_p4 = pnand %p926_p12, %p919_p13 }
  0x81   : > { %558 = shalt.err (!%p1078_p4)  }
  0x82   : > { %137 = dma.hbm_to_vmem [thread:$0]  %s124_s24, 16, %s908_s29, [#allocation3 + $0x3] }
  0x83   : > { %s940_s13 = smov 4  }
  0x84 LB: >> { %s144_s14 = sand.u32 3, %s743_s13  ;;  %s743_s13 = sphi %s940_s13, %s143_s13  }
  0x85   : >> { %s148_s20 = scalar_lea.sflag [#allocation3], %s144_s14 }
  0x86   : >> { %717 = dma.done.wait %s148_s20, 16 }
  0x87   : >> { %718 = vsyncadd %s148_s20, 4294967280  ;;  %s152_s5 = sadd.s32 %s743_s13, %s784_s18  ;;  %s156_s8 = scalar_lea.vmem [#allocation2], %s743_s13 }
  0x88   : >> { %s153_s6 = sld [smem:[#allocation6 + %s152_s5]]  ;;  %s164_s24 = sshll.u32 %s156_s8, 4  ;;  %s165_s24 = int_to_ptr.vmem [resolvable:$true] %s164_s24 }
  0x89   : >> { %s1100_s2 = sld [smem:[#allocation44_spill]] }
  0x8e   : >> { %s408_s12 = sshll.u32 %s153_s6, 4 }
  0x8f   : >> { %s155_s22 = scalar_lea.hbm %s1100_s2, %s408_s12 }
  0x90   : >> { %s559_s1 = scalar_lea.hbm %s155_s22, 16  ;;  %p562_p6 = scmp.lt.u32.totalorder %s155_s22, %s1100_s2 }
  0x91   : >> { %p560_p1 = scmp.ne.s32.totalorder %s155_s22, %s559_s1  ;;  %p563_p5 = scmp.lt.u32.totalorder %s808_s11, %s559_s1 }
  0x92   : >> { %p565_p8 = scmp.lt.u32.totalorder %s559_s1, %s155_s22 }
  0x93   : >> { %p564_p7 = por %p563_p5, %p562_p6 }
  0x95   : >> { %p566_p9 = por %p565_p8, %p564_p7 }
  0x97   : >> { %p567_p10 = pnand %p566_p9, %p560_p1 }
  0x99   : >> { %570 = shalt.err (!%p567_p10)  }
  0x9a   : >> { %s571_s5 = scalar_lea.vmem %s165_s24, 16  ;;  %p576_p4 = scmp.lt.s32.totalorder %s165_s24, %s788_s21 }
  0x9b   : >> { %p572_p11 = scmp.ne.s32.totalorder %s165_s24, %s571_s5  ;;  %p577_p13 = scmp.lt.s32.totalorder %s821_s16, %s571_s5 }
  0x9d   : >> { %p578_p12 = por %p577_p13, %p576_p4 }
  0x9f   : >> { %p579_p2 = pnand %p578_p12, %p572_p11 }
  0xa1   : >> { %582 = shalt.err (!%p579_p2)  }
  0xa2   : >> { %167 = dma.hbm_to_vmem [thread:$0]  %s155_s22, 16, %s165_s24, %s148_s20 }
  0xa3   : >> { %s143_s13 = sadd.s32 1, %s743_s13  }
  0xa4   : >> { %p140_p0 = scmp.ge.s32.totalorder %s143_s13, 8  }
  0xa6   : > { %142 = sbr.rel (!%p140_p0) target bundleno = 132 (0x84), region = 121 }
  0xad   : > { %719 = dma.done.wait [#allocation3], 16 }
  0xae   : > { %720 = vsyncadd [#allocation3], 4294967280 }
  0xaf   : > { %721 = dma.done.wait [#allocation3 + $0x1], 16 }
  0xb0   : > { %722 = vsyncadd [#allocation3 + $0x1], 4294967280 }
  0xb1   : > { %723 = dma.done.wait [#allocation3 + $0x2], 16 }
  0xb2   : > { %724 = vsyncadd [#allocation3 + $0x2], 4294967280 }
  0xb3   : > { %725 = dma.done.wait [#allocation3 + $0x3], 16 }
  0xb4   : > { %726 = vsyncadd [#allocation3 + $0x3], 4294967280  ;;  %s191_s1 = sld [smem:[#allocation6 + %s784_s18]]  ;;  %s1101_s17 = sadd.s32 1, %s784_s18  ;;  %v185_v0 = vld [vmem:[%s793_s26] sm:$0xff] }
  0xb5   : > { %s205_s22 = sld [smem:[#allocation6 + %s1101_s17]]  ;;  %s1102_s28 = sadd.s32 2, %s784_s18  ;;  %v187_v1 = vld [vmem:[#allocation2] sm:$0xff]  ;;  %v186_v2 = vmul.f32 0.25, %v185_v0 }
  0xb6   : > { %s220_s10 = sld [smem:[#allocation6 + %s1102_s28]]  ;;  %s1103_s13 = sadd.s32 3, %s784_s18  ;;  %v188_v3 = vmul.f32 0.75, %v187_v1 }
  0xb7   : > { %s235_s11 = sld [smem:[#allocation6 + %s1103_s13]]  ;;  %p1104_p0 = scmp.ne.s32.totalorder %s1091_s15, 0 }
  0xb8   : > { %v189_v4 = vadd.f32 %v188_v3, %v186_v2 }
  0xb9   : > { %p1105_p12 = pnand %p826_p3, %p1104_p0 }
  0xba   : > { %s409_s20 = sshll.u32 %s191_s1, 4  ;;  %190 = vst [vmem:[#allocation2] sm:$0xff] %v189_v4 }
  0xbb   : > { %s410_s6 = sshll.u32 %s205_s22, 4  ;;  %s193_s5 = scalar_lea.hbm %s1067_s3, %s409_s20 }
  0xbc   : > { %s411_s8 = sshll.u32 %s220_s10, 4  ;;  %s207_s28 = scalar_lea.hbm %s1067_s3, %s410_s6 }
  0xbd   : > { %s412_s24 = sshll.u32 %s235_s11, 4  ;;  %s978_s26 = scalar_lea.hbm %s1067_s3, %s411_s8 }
  0xbe   : > { %s983_s22 = scalar_lea.hbm %s1067_s3, %s412_s24 }
  0xbf   : > { %594 = shalt.err (!%p1105_p12)  }
  0xc0   : > { %s595_s10 = scalar_lea.hbm %s193_s5, 16  ;;  %s993_s20 = scalar_lea.hbm %s1067_s3, 2048 }
  0xc1   : > { %p596_p2 = scmp.ne.s32.totalorder %s193_s5, %s595_s10  ;;  %p598_p13 = scmp.lt.u32.totalorder %s193_s5, %s1067_s3 }
  0xc2   : > { %p599_p4 = scmp.lt.u32.totalorder %s993_s20, %s595_s10  ;;  %p601_p6 = scmp.lt.u32.totalorder %s595_s10, %s193_s5 }
  0xc4   : > { %p600_p1 = por %p599_p4, %p598_p13 }
  0xc6   : > { %p602_p5 = por %p601_p6, %p600_p1 }
  0xc8   : > { %p603_p7 = pnand %p602_p5, %p596_p2 }
  0xca   : > { %606 = shalt.err (!%p603_p7)  }
  0xcb   : > { %204 = dma.vmem_to_hbm [thread:$0]  %s788_s21, 16, %s193_s5, [#allocation4] }
  0xcc   : > { %p1106_p3 = scmp.ne.s32.totalorder %s1095_s9, 0  ;;  %p1107_p8 = scmp.ne.s32.totalorder %s1094_s7, 0 }
  0xce   : > { %p1108_p9 = pnand %p1106_p3, %p1107_p8 }
  0xd0   : > { %618 = shalt.err (!%p1108_p9)  }
  0xd1   : > { %s619_s18 = scalar_lea.hbm %s207_s28, 16  ;;  %p622_p11 = scmp.lt.u32.totalorder %s207_s28, %s1067_s3 }
  0xd2   : > { %p620_p10 = scmp.ne.s32.totalorder %s207_s28, %s619_s18  ;;  %p623_p0 = scmp.lt.u32.totalorder %s993_s20, %s619_s18 }
  0xd3   : > { %p625_p13 = scmp.lt.u32.totalorder %s619_s18, %s207_s28 }
  0xd4   : > { %p624_p12 = por %p623_p0, %p622_p11 }
  0xd6   : > { %p626_p2 = por %p625_p13, %p624_p12 }
  0xd8   : > { %p627_p4 = pnand %p626_p2, %p620_p10 }
  0xda   : > { %630 = shalt.err (!%p627_p4)  }
  0xdb   : > { %219 = dma.vmem_to_hbm [thread:$0]  %s803_s4, 16, %s207_s28, [#allocation4 + $0x1] }
  0xdc   : > { %p1109_p1 = scmp.ne.s32.totalorder %s1097_s27, 0  ;;  %p1110_p6 = scmp.ne.s32.totalorder %s1096_s25, 0 }
  0xde   : > { %p1111_p5 = pnand %p1109_p1, %p1110_p6 }
  0xe0   : > { %642 = shalt.err (!%p1111_p5)  }
  0xe1   : > { %s643_s7 = scalar_lea.hbm %s978_s26, 16  ;;  %p646_p3 = scmp.lt.u32.totalorder %s978_s26, %s1067_s3 }
  0xe2   : > { %p644_p7 = scmp.ne.s32.totalorder %s978_s26, %s643_s7  ;;  %p647_p8 = scmp.lt.u32.totalorder %s993_s20, %s643_s7 }
  0xe3   : > { %p649_p10 = scmp.lt.u32.totalorder %s643_s7, %s978_s26 }
  0xe4   : > { %p648_p9 = por %p647_p8, %p646_p3 }
  0xe6   : > { %p650_p11 = por %p649_p10, %p648_p9 }
  0xe8   : > { %p651_p0 = pnand %p650_p11, %p644_p7 }
  0xea   : > { %654 = shalt.err (!%p651_p0)  }
  0xeb   : > { %234 = dma.vmem_to_hbm [thread:$0]  %s874_s30, 16, %s978_s26, [#allocation4 + $0x2] }
  0xec   : > { %p1112_p12 = scmp.ne.s32.totalorder %s1099_s19, 0  ;;  %p1113_p13 = scmp.ne.s32.totalorder %s1098_s23, 0 }
  0xee   : > { %p1114_p2 = pnand %p1112_p12, %p1113_p13 }
  0xf0   : > { %666 = shalt.err (!%p1114_p2)  }
  0xf1   : > { %s667_s4 = scalar_lea.hbm %s983_s22, 16  ;;  %p670_p1 = scmp.lt.u32.totalorder %s983_s22, %s1067_s3 }
  0xf2   : > { %p668_p4 = scmp.ne.s32.totalorder %s983_s22, %s667_s4  ;;  %p671_p6 = scmp.lt.u32.totalorder %s993_s20, %s667_s4 }
  0xf3   : > { %p673_p7 = scmp.lt.u32.totalorder %s667_s4, %s983_s22 }
  0xf4   : > { %p672_p5 = por %p671_p6, %p670_p1 }
  0xf6   : > { %p674_p3 = por %p673_p7, %p672_p5 }
  0xf8   : > { %p675_p8 = pnand %p674_p3, %p668_p4 }
  0xfa   : > { %678 = shalt.err (!%p675_p8)  }
  0xfb   : > { %249 = dma.vmem_to_hbm [thread:$0]  %s908_s29, 16, %s983_s22, [#allocation4 + $0x3] }
  0xfc   : > { %s1040_s30 = smov 4  }
  0xfd LB: >> { %s256_s23 = sand.u32 3, %s747_s30  ;;  %s747_s30 = sphi %s1040_s30, %s255_s30  }
  0xfe   : >> { %s260_s19 = scalar_lea.sflag [#allocation4], %s256_s23 }
  0xff   : >> { %727 = dma.done.wait %s260_s19, 16 }
 0x100   : >> { %728 = vsyncadd %s260_s19, 4294967280  ;;  %s1115_s24 = sld [smem:[#allocation41_spill]]  ;;  %s1116_s12 = sld [smem:[#allocation42_spill]] }
 0x101   : >> { %s265_s29 = scalar_lea.vmem [#allocation2], %s747_s30 }
 0x102   : >> { %s275_s17 = sshll.u32 %s265_s29, 4  ;;  %s276_s17 = int_to_ptr.vmem [resolvable:$true] %s275_s17 }
 0x103   : >> { %s679_s22 = scalar_lea.vmem %s276_s17, 16  ;;  %p684_p10 = scmp.lt.s32.totalorder %s276_s17, %s788_s21 }
 0x104   : >> { %p680_p9 = scmp.ne.s32.totalorder %s276_s17, %s679_s22 }
 0x106   : >> { %s263_s14 = sadd.s32 %s747_s30, %s1115_s24  ;;  %p685_p11 = scmp.lt.s32.totalorder %s1116_s12, %s679_s22 }
 0x107   : >> { %s264_s5 = sld [smem:[#allocation6 + %s263_s14]] }
 0x108   : >> { %p686_p0 = por %p685_p11, %p684_p10 }
 0x10a   : >> { %p687_p12 = pnand %p686_p0, %p680_p9 }
 0x10d   : >> { %s413_s28 = sshll.u32 %s264_s5, 4 }
 0x10e   : >> { %s267_s1 = scalar_lea.hbm %s1067_s3, %s413_s28 }
 0x10f   : >> { %690 = shalt.err (!%p687_p12)  }
 0x110   : >> { %s691_s10 = scalar_lea.hbm %s267_s1, 16  ;;  %p694_p2 = scmp.lt.u32.totalorder %s267_s1, %s1067_s3 }
 0x111   : >> { %p692_p13 = scmp.ne.s32.totalorder %s267_s1, %s691_s10  ;;  %p695_p4 = scmp.lt.u32.totalorder %s993_s20, %s691_s10 }
 0x112   : >> { %p697_p6 = scmp.lt.u32.totalorder %s691_s10, %s267_s1 }
 0x113   : >> { %p696_p1 = por %p695_p4, %p694_p2 }
 0x115   : >> { %p698_p5 = por %p697_p6, %p696_p1 }
 0x117   : >> { %p699_p7 = pnand %p698_p5, %p692_p13 }
 0x119   : >> { %702 = shalt.err (!%p699_p7)  }
 0x11a   : >> { %278 = dma.vmem_to_hbm [thread:$0]  %s276_s17, 16, %s267_s1, %s260_s19 }
 0x11b   : >> { %s255_s30 = sadd.s32 1, %s747_s30  }
 0x11c   : >> { %p252_p3 = scmp.ge.s32.totalorder %s255_s30, 8  }
 0x11e   : > { %254 = sbr.rel (!%p252_p3) target bundleno = 253 (0xfd), region = 132 }
 0x125   : > { %729 = dma.done.wait [#allocation4], 16 }
 0x126   : > { %730 = vsyncadd [#allocation4], 4294967280 }
 0x127   : > { %731 = dma.done.wait [#allocation4 + $0x1], 16 }
 0x128   : > { %732 = vsyncadd [#allocation4 + $0x1], 4294967280 }
 0x129   : > { %733 = dma.done.wait [#allocation4 + $0x2], 16 }
 0x12a   : > { %734 = vsyncadd [#allocation4 + $0x2], 4294967280 }
 0x12b   : > { %735 = dma.done.wait [#allocation4 + $0x3], 16 }
 0x12c   : > { %736 = vsyncadd [#allocation4 + $0x3], 4294967280 }
 0x12d PF: > { %s1117_s6 = sld [smem:[#allocation40_spill]] }
 0x133   : > { %s19_s17 = sadd.s32 1, %s1117_s6  }
 0x134   : > { %p16_p8 = scmp.ge.s32.totalorder %s19_s17, 4  }
 0x136   :  { %18 = sbr.rel (!%p16_p8) target bundleno = 17 (0x11), region = 143 }
 0x13d   :  { %291 = vsyncmov [#allocation3] }
 0x140   :  { %s292_s16 = vpop.sfrf %291 }
 0x141   :  { %p414_p9 = scmp.ne.s32.totalorder %s292_s16, 0 }
 0x143   :  { %296 = shalt.err (%p414_p9)  }
 0x144   :  { %298 = vsyncmov [#allocation3 + $0x1] }
 0x147   :  { %s299_s21 = vpop.sfrf %298 }
 0x148   :  { %p415_p10 = scmp.ne.s32.totalorder %s299_s21, 0 }
 0x14a   :  { %303 = shalt.err (%p415_p10)  }
 0x14b   :  { %305 = vsyncmov [#allocation3 + $0x2] }
 0x14e   :  { %s306_s20 = vpop.sfrf %305 }
 0x14f   :  { %p416_p11 = scmp.ne.s32.totalorder %s306_s20, 0 }
 0x151   :  { %310 = shalt.err (%p416_p11)  }
 0x152   :  { %312 = vsyncmov [#allocation3 + $0x3] }
 0x155   :  { %s313_s18 = vpop.sfrf %312 }
 0x156   :  { %p417_p0 = scmp.ne.s32.totalorder %s313_s18, 0 }
 0x158   :  { %317 = shalt.err (%p417_p0)  }
 0x159   :  { %318 = vsyncmov [#allocation4] }
 0x15c   :  { %s319_s15 = vpop.sfrf %318 }
 0x15d   :  { %p418_p12 = scmp.ne.s32.totalorder %s319_s15, 0 }
 0x15f   :  { %323 = shalt.err (%p418_p12)  }
 0x160   :  { %325 = vsyncmov [#allocation4 + $0x1] }
 0x163   :  { %s326_s3 = vpop.sfrf %325 }
 0x164   :  { %p419_p13 = scmp.ne.s32.totalorder %s326_s3, 0 }
 0x166   :  { %330 = shalt.err (%p419_p13)  }
 0x167   :  { %332 = vsyncmov [#allocation4 + $0x2] }
 0x16a   :  { %s333_s0 = vpop.sfrf %332 }
 0x16b   :  { %p420_p2 = scmp.ne.s32.totalorder %s333_s0, 0 }
 0x16d   :  { %337 = shalt.err (%p420_p2)  }
 0x16e   :  { %339 = vsyncmov [#allocation4 + $0x3] }
 0x171   :  { %s340_s7 = vpop.sfrf %339 }
 0x172   :  { %p421_p4 = scmp.ne.s32.totalorder %s340_s7, 0 }
 0x174   :  { %344 = shalt.err (%p421_p4)  }

</bundles_post_ra>
